<compile_context>
chip_gen: v7x
topology: tpu7x:2x2x1
jax: 0.10.0
libtpu: 0.0.40
codegen_flags: <defaults>
</compile_context>

<pallas_src>
import functools

import numpy as np
import jax
import jax.numpy as jnp
from jax.experimental import pallas as pl
from jax.experimental.pallas import tpu as pltpu

LRELU_SLOPE = 0.2
BN_EPS = 1e-6
LINEAR_ROW_TILE = 512      # rows per tile for plain fused linears (mem-bound)
LFA_ROW_TILE = 128         # max centroids per tile for the fused LFA kernel
LFA_SOFTMAX_BYTES = 32 * 1024   # cap for each (tile, 2d) f32 softmax accumulator

_PARALLEL = pltpu.CompilerParams(dimension_semantics=("parallel",))
_LFA_PARAMS = pltpu.CompilerParams(dimension_semantics=("parallel",),
                                   vmem_limit_bytes=32 * 1024 * 1024)


def _round_up(n, m):
    return ((n + m - 1) // m) * m


def _lrelu(y):
    return jnp.where(y >= 0.0, y, LRELU_SLOPE * y)


def _apply_act(y, act):
    if act == "lrelu":
        return _lrelu(y)
    if act == "log_softmax":
        m = jnp.max(y, axis=-1, keepdims=True)
        z = y - m
        return z - jnp.log(jnp.sum(jnp.exp(z), axis=-1, keepdims=True))
    return y


# ---------------------------------------------------------------------------
# Pallas kernels: fused Linear (+BN, +activation, +residual)
# ---------------------------------------------------------------------------

def _linear_kernel(x_ref, w_ref, s_ref, t_ref, o_ref, *, act):
    # y = act((x @ w) * scale + shift)  -- bias already folded into shift.
    y = jnp.dot(x_ref[...].astype(jnp.bfloat16), w_ref[...],
                preferred_element_type=jnp.float32)
    o_ref[...] = _apply_act(y * s_ref[...] + t_ref[...], act)


def _linear_res_kernel(x_ref, w_ref, s_ref, t_ref, r_ref, o_ref, *, act):
    # y = act((x @ w) * scale + shift + residual)   (block mlp2 + shortcut)
    y = jnp.dot(x_ref[...].astype(jnp.bfloat16), w_ref[...],
                preferred_element_type=jnp.float32)
    o_ref[...] = _apply_act(y * s_ref[...] + t_ref[...] + r_ref[...], act)


def _dual_linear_kernel(x_ref, w1_ref, s1_ref, t1_ref,
                        w2_ref, s2_ref, t2_ref, o1_ref, o2_ref):
    # Block entry: mlp1 (LeakyReLU) and shortcut (no act) from the same x load.
    xb = x_ref[...].astype(jnp.bfloat16)
    y1 = jnp.dot(xb, w1_ref[...], preferred_element_type=jnp.float32)
    o1_ref[...] = _lrelu(y1 * s1_ref[...] + t1_ref[...])
    y2 = jnp.dot(xb, w2_ref[...], preferred_element_type=jnp.float32)
    o2_ref[...] = y2 * s2_ref[...] + t2_ref[...]


def _pick_rows_tile(m, max_tile, align):
    m_a = _round_up(max(m, 1), align)
    tile = min(max_tile, m_a)
    if m_a >= 2 * align:                    # keep >=2 grid programs (v7x dual-TC)
        tile = min(tile, _round_up((m_a + 1) // 2, align))
    return max(align, (tile // align) * align)


def _pad_rows(a, rows, axis=0):
    pad = rows - a.shape[axis]
    if pad <= 0:
        return a
    widths = [(0, 0)] * a.ndim
    widths[axis] = (0, pad)
    return jnp.pad(a, widths)


def fused_linear(x, p, act=None, residual=None):
    """x:(M,Cin) @ w(bf16):(Cin,Cout), folded BN, optional residual/activation."""
    w, scale, shift = p["w"], p["scale"], p["shift"]
    m, cin = x.shape
    cout = w.shape[1]
    tile = _pick_rows_tile(m, LINEAR_ROW_TILE, 8)
    m_pad = _round_up(max(m, 1), tile)
    x = _pad_rows(x, m_pad)

    in_specs = [
        pl.BlockSpec((tile, cin), lambda i: (i, 0)),
        pl.BlockSpec((cin, cout), lambda i: (0, 0)),
        pl.BlockSpec((1, cout), lambda i: (0, 0)),
        pl.BlockSpec((1, cout), lambda i: (0, 0)),
    ]
    args = [x, w, scale, shift]
    if residual is not None:
        in_specs.append(pl.BlockSpec((tile, cout), lambda i: (i, 0)))
        args.append(_pad_rows(residual, m_pad))
        kernel = functools.partial(_linear_res_kernel, act=act)
    else:
        kernel = functools.partial(_linear_kernel, act=act)

    out = pl.pallas_call(
        kernel,
        out_shape=jax.ShapeDtypeStruct((m_pad, cout), jnp.float32),
        grid=(m_pad // tile,),
        in_specs=in_specs,
        out_specs=pl.BlockSpec((tile, cout), lambda i: (i, 0)),
        compiler_params=_PARALLEL,
    )(*args)
    return out[:m] if m_pad != m else out


def fused_dual_linear(x, p1, p2):
    """mlp1 (lrelu) + shortcut (no act) from one pass over x.  Returns (h, sc)."""
    m, cin = x.shape
    c1 = p1["w"].shape[1]
    c2 = p2["w"].shape[1]
    tile = _pick_rows_tile(m, LINEAR_ROW_TILE, 8)
    m_pad = _round_up(max(m, 1), tile)
    x = _pad_rows(x, m_pad)
    const = lambda i: (0, 0)

    o1, o2 = pl.pallas_call(
        _dual_linear_kernel,
        out_shape=(jax.ShapeDtypeStruct((m_pad, c1), jnp.float32),
                   jax.ShapeDtypeStruct((m_pad, c2), jnp.float32)),
        grid=(m_pad // tile,),
        in_specs=[
            pl.BlockSpec((tile, cin), lambda i: (i, 0)),
            pl.BlockSpec((cin, c1), const),
            pl.BlockSpec((1, c1), const),
            pl.BlockSpec((1, c1), const),
            pl.BlockSpec((cin, c2), const),
            pl.BlockSpec((1, c2), const),
            pl.BlockSpec((1, c2), const),
        ],
        out_specs=(pl.BlockSpec((tile, c1), lambda i: (i, 0)),
                   pl.BlockSpec((tile, c2), lambda i: (i, 0))),
        compiler_params=_PARALLEL,
    )(x, p1["w"], p1["scale"], p1["shift"], p2["w"], p2["scale"], p2["shift"])
    if m_pad != m:
        o1, o2 = o1[:m], o2[:m]
    return o1, o2


# ---------------------------------------------------------------------------
# Pallas kernel: fused LocalFeatureAggregation
# ---------------------------------------------------------------------------

def _lfa_kernel(xj_ref, pj_ref, pi_ref,
                wie_ref, wje_ref, wd_ref, se_ref, te_ref,
                watt_ref, wpost_ref, sp_ref, tp_ref,
                o_ref, feat_ref, score_ref):
    """Fused LocalFeatureAggregation for one tile of centroids.

    Phase 1: relative-position encoding (VPU FMAs, diff weights host-folded),
             encoder BN+LeakyReLU, stack [x_j | enc_j] into VMEM scratch.
    Phase 2: one merged (2d, 2d) attention matmul with M = k*tile.
    Phase 3: per-channel softmax over the k neighbours + weighted sum.
    Phase 4: merged post-attention SharedMLP (folded BN) + LeakyReLU.
    """
    f32, bf16 = jnp.float32, jnp.bfloat16
    k, tile, d = xj_ref.shape
    c = 2 * d

    pos_i = pi_ref[...]                                          # (tile, 3)
    pix, piy, piz = pos_i[:, 0:1], pos_i[:, 1:2], pos_i[:, 2:3]
    wie = wie_ref[...]                                           # (3, d)
    wje = wje_ref[...]                                           # (3, d)
    wi0, wi1, wi2 = wie[0:1, :], wie[1:2, :], wie[2:3, :]
    wj0, wj1, wj2 = wje[0:1, :], wje[1:2, :], wje[2:3, :]
    wd = wd_ref[...]                                             # (1, d)
    se, te = se_ref[...], te_ref[...]
    # pos_i contribution is shared across all k neighbours (no MXU needed).
    enc_base = pix * wi0 + piy * wi1 + piz * wi2                 # (tile, d)

    # --- Phase 1: build the stacked [x_j | enc_j] bf16 slab -----------------
    for j in range(k):
        pos_j = pj_ref[j]                                        # (tile, 3)
        pjx, pjy, pjz = pos_j[:, 0:1], pos_j[:, 1:2], pos_j[:, 2:3]
        dx, dy, dz = pjx - pix, pjy - piy, pjz - piz
        dist = jnp.sqrt(dx * dx + dy * dy + dz * dz)             # (tile, 1)
        enc = enc_base + pjx * wj0 + pjy * wj1 + pjz * wj2 + dist * wd
        enc = _lrelu(enc * se + te)                              # (tile, d)
        feat_ref[j * tile:(j + 1) * tile, :] = jnp.concatenate(
            [xj_ref[j], enc.astype(bf16)], axis=-1)              # lane-dense store

    # --- Phase 2: one attention matmul for all k*tile rows ------------------
    score_ref[...] = jnp.dot(feat_ref[...], watt_ref[...],
                             preferred_element_type=f32)

    # --- Phase 3: softmax over the k row-groups + weighted sum --------------
    mx = score_ref[0:tile, :]
    for j in range(1, k):
        mx = jnp.maximum(mx, score_ref[j * tile:(j + 1) * tile, :])
    denom = jnp.zeros((tile, c), f32)
    acc = jnp.zeros((tile, c), f32)
    for j in range(k):
        e = jnp.exp(score_ref[j * tile:(j + 1) * tile, :] - mx)
        denom = denom + e
        acc = acc + e * feat_ref[j * tile:(j + 1) * tile, :].astype(f32)
    pooled = acc * pl.reciprocal(denom, approx=True)             # (tile, 2d)

    # --- Phase 4: post-attention SharedMLP ----------------------------------
    out = jnp.dot(pooled.astype(bf16), wpost_ref[...],
                  preferred_element_type=f32)
    o_ref[...] = _lrelu(out * sp_ref[...] + tp_ref[...])


def _lfa_tile(n, d):
    c = 2 * d
    # cap so each (tile, 2d) f32 softmax accumulator stays <= LFA_SOFTMAX_BYTES
    tile = min(LFA_ROW_TILE, max(16, (LFA_SOFTMAX_BYTES // (4 * c)) // 16 * 16))
    n16 = _round_up(max(n, 1), 16)
    if n16 >= 32:                       # >=2 grid programs when rows allow (v7x)
        tile = min(tile, _round_up((n16 + 1) // 2, 16))
    return min(tile, n16)


def lfa_fused(x_j, pos_j, pos_i, p):
    """x_j:(K,N,d) bf16, pos_j:(K,N,3), pos_i:(N,3) -> (N, 2d) attention output."""
    k, n, d = x_j.shape
    c = 2 * d
    tile = _lfa_tile(n, d)
    n_pad = _round_up(max(n, 1), tile)
    x_j = _pad_rows(x_j, n_pad, axis=1)
    pos_j = _pad_rows(pos_j, n_pad, axis=1)
    pos_i = _pad_rows(pos_i, n_pad, axis=0)
    const = lambda i: (0, 0)

    out = pl.pallas_call(
        _lfa_kernel,
        out_shape=jax.ShapeDtypeStruct((n_pad, c), jnp.float32),
        grid=(n_pad // tile,),
        in_specs=[
            pl.BlockSpec((k, tile, d), lambda i: (0, i, 0)),   # neighbour feats
            pl.BlockSpec((k, tile, 3), lambda i: (0, i, 0)),   # neighbour pos
            pl.BlockSpec((tile, 3), lambda i: (i, 0)),         # centroid pos
            pl.BlockSpec((3, d), const),                       # enc rows (wpi-wpd)
            pl.BlockSpec((3, d), const),                       # enc rows (wpj+wpd)
            pl.BlockSpec((1, d), const),                       # enc dist row
            pl.BlockSpec((1, d), const),                       # enc BN scale
            pl.BlockSpec((1, d), const),                       # enc BN shift
            pl.BlockSpec((c, c), const),                       # attention W (merged)
            pl.BlockSpec((c, c), const),                       # post-attn W (merged)
            pl.BlockSpec((1, c), const),                       # post BN scale
            pl.BlockSpec((1, c), const),                       # post BN shift
        ],
        out_specs=pl.BlockSpec((tile, c), lambda i: (i, 0)),
        scratch_shapes=[
            pltpu.VMEM((k * tile, c), jnp.bfloat16),           # stacked [x|enc]
            pltpu.VMEM((k * tile, c), jnp.float32),            # attention scores
        ],
        compiler_params=_LFA_PARAMS,
    )(x_j, pos_j, pos_i,
      p["enc_wi"], p["enc_wj"], p["enc_wd"], p["enc_scale"], p["enc_shift"],
      p["att_w"], p["post_w"], p["post_scale"], p["post_shift"])
    return out[:n] if n_pad != n else out


# ---------------------------------------------------------------------------
# Parameter initialization (deterministic, matches module __init__ shapes)
# ---------------------------------------------------------------------------

def _init_linear(key, cin, cout, bias=True):
    kw, kb = jax.random.split(key)
    w = jax.random.normal(kw, (cin, cout), jnp.float32) / np.sqrt(cin)
    b = (jax.random.normal(kb, (cout,), jnp.float32) * 0.01
         if bias else jnp.zeros((cout,), jnp.float32))
    return w, b


def _fold_bn(key, b, cout, norm=True):
    kg, kb = jax.random.split(key)
    if norm:
        gamma = jax.random.uniform(kg, (cout,), jnp.float32, 0.8, 1.2)
        beta = jax.random.normal(kb, (cout,), jnp.float32) * 0.05
        scale = gamma / jnp.sqrt(1.0 + BN_EPS)    # eval-mode: mean=0, var=1
    else:
        scale = jnp.ones((cout,), jnp.float32)
        beta = jnp.zeros((cout,), jnp.float32)
    shift = b * scale + beta                      # fold Linear bias into BN shift
    return scale.reshape(1, cout), shift.reshape(1, cout)


def init_shared_layer(key, cin, cout, bias=True, norm=True):
    k1, k2 = jax.random.split(key)
    w, b = _init_linear(k1, cin, cout, bias)
    scale, shift = _fold_bn(k2, b, cout, norm)
    return dict(w=w.astype(jnp.bfloat16), scale=scale, shift=shift)


def init_lfa(key, channels):
    d = channels // 2
    c = channels
    k1, k2, k3, k4 = jax.random.split(key, 4)
    # locSE encoder SharedMLP([10, d]):  rel = [pos_i, pos_j, diff, dist]
    we, be = _init_linear(k1, 10, d)
    scale, shift = _fold_bn(k2, be, d)
    # fold diff@W_diff into pos_i / pos_j rows (diff = pos_j - pos_i)
    enc_wi = we[0:3] - we[6:9]
    enc_wj = we[3:6] + we[6:9]
    enc_wd = we[9:10]
    # attention Linear(C, C, bias=False): merged (2d, 2d), bf16
    wa, _ = _init_linear(k3, c, c, bias=False)
    # post-attention SharedMLP([C, C]): merged (2d, 2d), bf16, folded BN
    post = init_shared_layer(k4, c, c)
    return dict(
        enc_wi=enc_wi, enc_wj=enc_wj, enc_wd=enc_wd,
        enc_scale=scale, enc_shift=shift,
        att_w=wa.astype(jnp.bfloat16),
        post_w=post["w"], post_scale=post["scale"], post_shift=post["shift"],
    )


def init_block(key, d_in, d_out):
    k1, k2, k3, k4, k5 = jax.random.split(key, 5)
    return dict(
        mlp1=init_shared_layer(k1, d_in, d_out // 8),
        shortcut=init_shared_layer(k2, d_in, d_out),
        mlp2=init_shared_layer(k3, d_out // 2, d_out),
        lfa1=init_lfa(k4, d_out // 4),
        lfa2=init_lfa(k5, d_out // 2),
    )


def init_model(key, num_features, num_classes):
    d = max(32, num_classes, num_features)   # d_bottleneck
    ks = jax.random.split(key, 13)
    params = dict(
        fc0=init_shared_layer(ks[0], num_features, d, norm=False),
        block1=init_block(ks[1], d, 32),
        block2=init_block(ks[2], 32, 128),
        block3=init_block(ks[3], 128, 256),
        block4=init_block(ks[4], 256, 512),
        mlp_summit=init_shared_layer(ks[5], 512, 512),
        fp4=init_shared_layer(ks[6], 512 + 256, 256),
        fp3=init_shared_layer(ks[7], 256 + 128, 128),
        fp2=init_shared_layer(ks[8], 128 + 32, 32),
        fp1=init_shared_layer(ks[9], 32 + 32, d),
        clf1=init_shared_layer(ks[10], d, 64),
        clf2=init_shared_layer(ks[11], 64, 32),
        fc_classif=init_shared_layer(ks[12], 32, num_classes, norm=False),
    )
    return params, d


# ---------------------------------------------------------------------------
# Graph glue (plain JAX / numpy)
# ---------------------------------------------------------------------------

def apply_shared(p, x, act="lrelu", residual=None):
    return fused_linear(x, p, act=act, residual=residual)


def knn_idx(pos, batch, k):
    """k nearest neighbors (including self, per-cloud) -> (N, k) indices."""
    # TODO(synk): O(N^2) dense distance matrix; replace with tiled/batched top-k
    # for realistic point counts.
    d2 = jnp.sum((pos[:, None, :] - pos[None, :, :]) ** 2, axis=-1)
    mask = batch[:, None] != batch[None, :]
    d2 = jnp.where(mask, jnp.inf, d2)
    _, idx = jax.lax.top_k(-d2, k)
    return idx


def nn_interpolate(x, pos_src, pos_tgt, batch_src, batch_tgt):
    """knn_interpolate with k=1 -> nearest-neighbor feature copy."""
    d2 = jnp.sum((pos_tgt[:, None, :] - pos_src[None, :, :]) ** 2, axis=-1)
    mask = batch_tgt[:, None] != batch_src[None, :]
    d2 = jnp.where(mask, jnp.inf, d2)
    idx = jnp.argmin(d2, axis=1)
    return x[idx]


def decimation_indices_np(ptr, factor, rng):
    bincount = ptr[1:] - ptr[:-1]
    dec = np.maximum(1, bincount // factor)
    idx = np.concatenate(
        [ptr[i] + rng.permutation(int(bincount[i]))[: int(dec[i])]
         for i in range(len(bincount))]
    )
    ptr_new = np.concatenate([[0], np.cumsum(dec)])
    return jnp.asarray(idx, dtype=jnp.int32), ptr_new


def apply_lfa(p, nbrs_t, pos_j, x, pos):
    # Gather neighbour features in bf16 (halves the (K, N, d) HBM stream).
    x_j = x.astype(jnp.bfloat16)[nbrs_t]           # (K, N, d)
    return lfa_fused(x_j, pos_j, pos, p)


def apply_block(p, x, pos, batch, k):
    nbrs_t = knn_idx(pos, batch, k).T               # (K, N)
    pos_j = pos[nbrs_t]                             # gathered once for both LFAs
    # TODO(synk): for large N / d>=64, DMA-gather neighbours in-kernel via
    # scalar-prefetched indices instead of materializing (K, N, d) in HBM.
    h, shortcut = fused_dual_linear(x, p["mlp1"], p["shortcut"])
    h = apply_lfa(p["lfa1"], nbrs_t, pos_j, h, pos)
    h = apply_lfa(p["lfa2"], nbrs_t, pos_j, h, pos)
    # mlp2 (Linear+BN) + residual add + LeakyReLU fused into one kernel.
    return apply_shared(p["mlp2"], h, act="lrelu", residual=shortcut)


def apply_fp(p_nn, x, pos, batch, x_skip, pos_skip, batch_skip):
    xi = nn_interpolate(x, pos, pos_skip, batch, batch_skip)
    xcat = jnp.concatenate([xi, x_skip], axis=1)
    return apply_shared(p_nn, xcat, act="lrelu")


def forward(params, x, pos, batch, ptr, decimation, num_neighbors):
    rng = np.random.default_rng(0)  # deterministic decimation permutations
    # TODO(synk): decimation permutations drawn on host (NumPy) like
    # torch.randperm; keeps shapes static per level but is not jittable.

    h = apply_shared(params["fc0"], x, act=None)
    b1 = apply_block(params["block1"], h, pos, batch, num_neighbors)

    idx1, ptr1 = decimation_indices_np(ptr, decimation, rng)
    x1, pos1, batch1 = b1[idx1], pos[idx1], batch[idx1]
    b2 = apply_block(params["block2"], x1, pos1, batch1, num_neighbors)

    idx2, ptr2 = decimation_indices_np(ptr1, decimation, rng)
    x2, pos2, batch2 = b2[idx2], pos1[idx2], batch1[idx2]
    b3 = apply_block(params["block3"], x2, pos2, batch2, num_neighbors)

    idx3, ptr3 = decimation_indices_np(ptr2, decimation, rng)
    x3, pos3, batch3 = b3[idx3], pos2[idx3], batch2[idx3]
    b4 = apply_block(params["block4"], x3, pos3, batch3, num_neighbors)

    idx4, _ = decimation_indices_np(ptr3, decimation, rng)
    x4, pos4, batch4 = b4[idx4], pos3[idx4], batch3[idx4]

    summit = apply_shared(params["mlp_summit"], x4, act="lrelu")

    f4 = apply_fp(params["fp4"], summit, pos4, batch4, x3, pos3, batch3)
    f3 = apply_fp(params["fp3"], f4, pos3, batch3, x2, pos2, batch2)
    f2 = apply_fp(params["fp2"], f3, pos2, batch2, x1, pos1, batch1)
    f1 = apply_fp(params["fp1"], f2, pos1, batch1, b1, pos, batch)

    c = apply_shared(params["clf1"], f1, act="lrelu")
    c = apply_shared(params["clf2"], c, act="lrelu")
    # fc_classif + log_softmax fused into the final kernel call
    return apply_shared(params["fc_classif"], c, act="log_softmax")


# ---------------------------------------------------------------------------

if __name__ == "__main__":
    key = jax.random.PRNGKey(0)
    num_features, num_classes = 3, 6
    decimation, num_neighbors = 2, 4        # small synthetic config
    points_per_cloud, n_clouds = 64, 2
    n_points = points_per_cloud * n_clouds

    kx, kp, kparams = jax.random.split(key, 3)
    x = jax.random.normal(kx, (n_points, num_features), jnp.float32)
    pos = jax.random.uniform(kp, (n_points, 3), jnp.float32)
    batch = jnp.repeat(jnp.arange(n_clouds, dtype=jnp.int32), points_per_cloud)
    ptr = np.arange(n_clouds + 1, dtype=np.int64) * points_per_cloud

    params, d_bottleneck = init_model(kparams, num_features, num_classes)

    log_probas = forward(params, x, pos, batch, ptr, decimation, num_neighbors)
    log_probas = jax.block_until_ready(log_probas)

    assert log_probas.shape == (n_points, num_classes)
    assert bool(jnp.all(jnp.isfinite(log_probas)))
    # log-softmax rows should sum to ~1 in prob space
    row_sums = jnp.sum(jnp.exp(log_probas), axis=-1)
    assert bool(jnp.all(jnp.abs(row_sums - 1.0) < 1e-3))
    print("KERNEL_OK")
</pallas_src>

<mosaic_0001>
module attributes {stable_mosaic.version = 11 : i64} {
  func.func @_linear_kernel(%arg0: i32, %arg1: memref<64x3xf32, #tpu.memory_space<vmem>>, %arg2: memref<3x32xbf16, #tpu.memory_space<vmem>>, %arg3: memref<1x32xf32, #tpu.memory_space<vmem>>, %arg4: memref<1x32xf32, #tpu.memory_space<vmem>>, %arg5: memref<64x32xf32, #tpu.memory_space<vmem>>) attributes {dimension_semantics = [#tpu.dimension_semantics<parallel>], iteration_bounds = array<i64: 2>, scalar_prefetch = 0 : i64, scratch_operands = 0 : i64, tpu.core_type = #tpu.core_type<tc>, window_params = [{transform_indices = @transform_0, window_bounds = array<i64: 64, 3>}, {pipeline_mode = #tpu.pipeline_mode<synchronous>, transform_indices = @transform_1, window_bounds = array<i64: 3, 32>}, {pipeline_mode = #tpu.pipeline_mode<synchronous>, transform_indices = @transform_2, window_bounds = array<i64: 1, 32>}, {pipeline_mode = #tpu.pipeline_mode<synchronous>, transform_indices = @transform_3, window_bounds = array<i64: 1, 32>}, {transform_indices = @transform_4, window_bounds = array<i64: 64, 32>}]} {
    %c0 = arith.constant 0 : index
    %c0_0 = arith.constant 0 : index
    %0 = vector.load %arg1[%c0, %c0_0] : memref<64x3xf32, #tpu.memory_space<vmem>>, vector<64x3xf32>
    %1 = arith.truncf %0 : vector<64x3xf32> to vector<64x3xbf16>
    %c0_1 = arith.constant 0 : index
    %c0_2 = arith.constant 0 : index
    %2 = vector.load %arg2[%c0_1, %c0_2] : memref<3x32xbf16, #tpu.memory_space<vmem>>, vector<3x32xbf16>
    %cst = arith.constant dense<0.000000e+00> : vector<64x32xf32>
    %3 = tpu.matmul %1, %2, %cst {dimension_numbers = #tpu.dot_dimension_numbers<[1], [0], [0], [1], [0, 0, 1, 1], [], []>} : vector<64x3xbf16>, vector<3x32xbf16>, vector<64x32xf32> -> vector<64x32xf32>
    %c0_3 = arith.constant 0 : index
    %c0_4 = arith.constant 0 : index
    %4 = vector.load %arg3[%c0_3, %c0_4] : memref<1x32xf32, #tpu.memory_space<vmem>>, vector<1x32xf32>
    %5 = vector.broadcast %4 : vector<1x32xf32> to vector<64x32xf32>
    %6 = arith.mulf %3, %5 : vector<64x32xf32>
    %c0_5 = arith.constant 0 : index
    %c0_6 = arith.constant 0 : index
    %7 = vector.load %arg4[%c0_5, %c0_6] : memref<1x32xf32, #tpu.memory_space<vmem>>, vector<1x32xf32>
    %8 = vector.broadcast %7 : vector<1x32xf32> to vector<64x32xf32>
    %9 = arith.addf %6, %8 : vector<64x32xf32>
    %c0_7 = arith.constant 0 : index
    %c0_8 = arith.constant 0 : index
    %10 = vector.load %arg5[%c0_7, %c0_8] : memref<64x32xf32, #tpu.memory_space<vmem>>, vector<64x32xf32>
    tpu.vector_store %arg5[%c0_7, %c0_8], %9 {strides = array<i32>} : memref<64x32xf32, #tpu.memory_space<vmem>>, vector<64x32xf32>,
    return
  }
  func.func @transform_0(%arg0: i32) -> (i32, i32) {
    %c0_i32 = arith.constant 0 : i32
    %c0_i32_0 = arith.constant 0 : i32
    return %arg0, %c0_i32 : i32, i32
  }
  func.func @transform_1(%arg0: i32) -> (i32, i32) {
    %c0_i32 = arith.constant 0 : i32
    %c0_i32_0 = arith.constant 0 : i32
    %c0_i32_1 = arith.constant 0 : i32
    return %c0_i32, %c0_i32_0 : i32, i32
  }
  func.func @transform_2(%arg0: i32) -> (i32, i32) {
    %c0_i32 = arith.constant 0 : i32
    %c0_i32_0 = arith.constant 0 : i32
    %c0_i32_1 = arith.constant 0 : i32
    return %c0_i32, %c0_i32_0 : i32, i32
  }
  func.func @transform_3(%arg0: i32) -> (i32, i32) {
    %c0_i32 = arith.constant 0 : i32
    %c0_i32_0 = arith.constant 0 : i32
    %c0_i32_1 = arith.constant 0 : i32
    return %c0_i32, %c0_i32_0 : i32, i32
  }
  func.func @transform_4(%arg0: i32) -> (i32, i32) {
    %c0_i32 = arith.constant 0 : i32
    %c0_i32_0 = arith.constant 0 : i32
    return %arg0, %c0_i32 : i32, i32
  }
}

</mosaic_0001>

<bundles_post_ra>
// kernel: tpu_custom_call.1
= control target key start
LH: loop header
LB: loop body
LE: loop exit
PB: predicated region body
PF: predicated region fallthrough
CT: control target
= control target key end

     0   :  { %s472_s15 = smov 0   ;;  %s509_s0 = inlined_call_operand.vmem [shape: f32[128,3], index: 0, kind: input, shape index: {}]   ;;  %s510_s1 = inlined_call_operand.vmem [shape: bf16[3,32], index: 1, kind: input, shape index: {}]   ;;  %s511_s2 = inlined_call_operand.vmem [shape: f32[1,32], index: 2, kind: input, shape index: {}]   ;;  %s512_s3 = inlined_call_operand.vmem [shape: f32[1,32], index: 3, kind: input, shape index: {}]   ;;  %s513_s4 = inlined_call_operand.vmem [shape: f32[128,32], index: 4, kind: output, shape index: {}]  }
   0x1 LB: > { %s395_s16 = sadd.s32 4294967295, %s444_s15   ;;  %p399_p0 = scmp.ge.s32.totalorder %s444_s15, 1  ;;  %s444_s15 = sphi %s472_s15, %s14_s15  }
   0x2   : > { %p163_p1 = scmp.lt.s32.totalorder %s444_s15, 3 }
   0x4   : > { %p164_p2 = pnand %p399_p0, %p163_p1 }
   0x5   : > { %v214_v0 = vld [vmem:[%s510_s1] sm:$0x3] (!%p164_p2)  ;;  %vm228_vm0 = vcmask (!%p164_p2), 1040384   ;;  %vm229_vm1 = vcmask (!%p164_p2), 1041408   ;;  %s400_s19 = sshll.u32 (!%p164_p2), %s395_s16, 3  ;;  %v446_v1 = vmov (!%p164_p2), 65535  }
   0x6   : > { %167 = sbr.rel (%p164_p2) target bundleno = 241 (0xf1), region = 36  ;;  %v230_v2 = vsel (!%p164_p2), %vm228_vm0, 4294967295, %v446_v1  ;;  %p190_p3 = scmp.lt.s32.totalorder (!%p164_p2), %s400_s19, 15  ;;  %vm215_vm2 = vcmask (!%p164_p2), 23552   ;;  %v408_v17 = vld [vmem:[%s511_s2] ss:$0 sm:$0xff] (!%p164_p2) }
   0x7   : > { %v231_v3 = vsel (!%p164_p2), %vm229_vm1, %v230_v2, 0  ;;  %v409_v19 = vld [vmem:[%s512_s3] ss:$0 sm:$0xff] (!%p164_p2)  ;;  %vm330_vm3 = vcmask (!%p164_p2), 261120  }
   0x8   : > { %v233_v4 = vand.u32 (!%p164_p2), %v231_v3, %v214_v0 }
   0xa   : > { %417 = vmatprep.subr.bf16.mxu0 (!%p164_p2), %v233_v4  ;;  %427 = vmatprep.subr.bf16.mxu1 (!%p164_p2), %v233_v4 }
   0xb   : > { %418 = vmatpush3.bf16.msra.mxu0 (!%p164_p2), %v233_v4  ;;  %428 = vmatpush3.bf16.msra.mxu1 (!%p164_p2), %v233_v4 }
   0xd   : > { %s515_s19 = smov (!%p190_p3, %s400_s19), 15 }
   0xe   : > { %s401_s20 = sshll.u32 %s515_s19, 3 }
   0xf   : > { %s193_s23 = scalar_lea.vmem %s509_s0, %s401_s20  ;;  %s199_s30 = scalar_lea.vmem %s513_s4, %s401_s20 }
  0x10   : > { %v202_v5 = vld [vmem:[%s193_s23] sm:$0xff]  ;;  %v203_v6 = vld [vmem:[%s193_s23 + $0x8] sm:$0xff]  ;;  %v204_v10 = vld [vmem:[%s193_s23 + $0x10] sm:$0xff] }
  0x11   : > { %v206_v7 = vld [vmem:[%s193_s23 + $0x20] sm:$0xff]  ;;  %v210_v8 = vpack.c.bf16 %v203_v6, %v202_v5  ;;  %v207_v9 = vld [vmem:[%s193_s23 + $0x28] sm:$0xff]  ;;  %v205_v11 = vld [vmem:[%s193_s23 + $0x18] sm:$0xff] }
  0x12   : > { %v212_v12 = vpack.c.bf16 %v207_v9, %v206_v7  ;;  %v211_v13 = vpack.c.bf16 %v205_v11, %v204_v10  ;;  %v208_v14 = vld [vmem:[%s193_s23 + $0x30] sm:$0xff]  ;;  %v209_v15 = vld [vmem:[%s193_s23 + $0x38] sm:$0xff] }
  0x13   : > { %419 = vmatprep.mubr.msk.bf16.mxu0 %vm215_vm2, %v210_v8  ;;  %v213_v16 = vpack.c.bf16 %v209_v15, %v208_v14 }
  0x14   : > { %423 = vmatprep.mubr.msk.bf16.mxu1 %vm215_vm2, %v212_v12  ;;  %420 = vmatmul.mubr.msk.bf16.vlgmr.msra.gmra.mrb[0].mxu0 %vm215_vm2, %v211_v13 }
  0x15   : > { %424 = vmatmul.mubr.msk.bf16.vlgmr.msra.gmra.mrb[0].mxu1 %vm215_vm2, %v213_v16 }
  0xe7   : > { %v421_v18 = vpop.f32.mrb[0].mxu0 }
  0xe8   : > { %v309_v20 = vmul.f32 %v421_v18, %v408_v17  ;;  %v425_v21 = vpop.f32.mrb[0].mxu1  ;;  %v269_v22 = vpop.f32.mrb[1].mxu0 }
  0xe9   : > { %v313_v23 = vmul.f32 %v425_v21, %v408_v17  ;;  %v307_v24 = vmul.f32 %v408_v17, %v269_v22  ;;  %v285_v25 = vpop.f32.mrb[1].mxu1  ;;  %v422_v26 = vpop.f32.mrb[2].mxu0 }
  0xea   : > { %v324_v27 = vadd.f32 %v409_v19, %v309_v20  ;;  %v311_v28 = vmul.f32 %v408_v17, %v285_v25  ;;  %v310_v29 = vmul.f32 %v422_v26, %v408_v17  ;;  %v426_v30 = vpop.f32.mrb[2].mxu1  ;;  %v272_v31 = vpop.f32.mrb[3].mxu0 }
  0xeb   : > { %v328_v32 = vadd.f32 %v409_v19, %v313_v23  ;;  %v322_v33 = vadd.f32 %v409_v19, %v307_v24  ;;  %v314_v34 = vmul.f32 %v426_v30, %v408_v17  ;;  %v308_v35 = vmul.f32 %v408_v17, %v272_v31  ;;  %v288_v36 = vpop.f32.mrb[3].mxu1 }
  0xec   : > { %333 = vst.msk [vmem:[%s199_s30 + $0x10] sm:$0xff] %vm330_vm3, %v324_v27  ;;  %v326_v37 = vadd.f32 %v409_v19, %v311_v28  ;;  %v325_v38 = vadd.f32 %v409_v19, %v310_v29  ;;  %v312_v39 = vmul.f32 %v408_v17, %v288_v36 }
  0xed   : > { %337 = vst.msk [vmem:[%s199_s30 + $0x30] sm:$0xff] %vm330_vm3, %v328_v32  ;;  %331 = vst.msk [vmem:[%s199_s30] sm:$0xff] %vm330_vm3, %v322_v33  ;;  %v329_v40 = vadd.f32 %v409_v19, %v314_v34  ;;  %v323_v41 = vadd.f32 %v409_v19, %v308_v35 }
  0xee   : > { %335 = vst.msk [vmem:[%s199_s30 + $0x20] sm:$0xff] %vm330_vm3, %v326_v37  ;;  %334 = vst.msk [vmem:[%s199_s30 + $0x18] sm:$0xff] %vm330_vm3, %v325_v38  ;;  %v327_v42 = vadd.f32 %v409_v19, %v312_v39 }
  0xef   : > { %338 = vst.msk [vmem:[%s199_s30 + $0x38] sm:$0xff] %vm330_vm3, %v329_v40  ;;  %332 = vst.msk [vmem:[%s199_s30 + $0x8] sm:$0xff] %vm330_vm3, %v323_v41 }
  0xf0   : > { %336 = vst.msk [vmem:[%s199_s30 + $0x28] sm:$0xff] %vm330_vm3, %v327_v42 }
  0xf1 PF: > { %s14_s15 = sadd.s32 1, %s444_s15  }
  0xf2   : > { %p11_p4 = scmp.ge.s32.totalorder %s14_s15, 4  }
  0xf4   :  { %13 = sbr.rel (!%p11_p4) target bundleno = 1 (0x1), region = 66 }

</bundles_post_ra>
